<compile_context>
chip_gen: v6e
topology: v6e:2x2x1
jax: 0.10.0
libtpu: 0.0.40
codegen_flags: <defaults>
</compile_context>

<pallas_src>
import jax
import jax.numpy as jnp
from jax.experimental import pallas as pl
from jax.experimental.pallas import tpu as pltpu


def _round_up(a: int, b: int) -> int:
    return ((a + b - 1) // b) * b


def _interior_selection_matrix(C: int, H: int, W: int) -> jax.Array:
    """S[c*H*W + h*W + w, i*B + j] = 1.0 iff (h, w) == (i+1, j+1), B = H-2.

    x.reshape(N, C*H*W) @ S  ==  sum_c x[:, :, 1:-1, 1:-1] flattened row-major,
    i.e. exactly `torch.sum(x[:, :, 1:-1, 1:-1], dim=1).view(-1, B*B)`.
    """
    B = H - 2
    h_sel = jnp.arange(H)[:, None] == (jnp.arange(B)[None, :] + 1)        # (H, B)
    w_sel = jnp.arange(W)[:, None] == (jnp.arange(B)[None, :] + 1)        # (W, B)
    spatial = h_sel[:, None, :, None] & w_sel[None, :, None, :]           # (H, W, B, B)
    spatial = spatial.reshape(H * W, B * B).astype(jnp.float32)           # (H*W, B*B)
    return jnp.tile(spatial, (C, 1))                                      # (C*H*W, B*B)


def _noswitch_kernel(x_ref, y_ref, sel_ref, o_ref):
    # x_ref:   (TB, C*H*W)  flattened NCHW board rows
    # y_ref:   (TB, B*B)    internal-model logits
    # sel_ref: (C*H*W, B*B) 0/1 interior-selection / channel-sum matrix
    illegal = jnp.dot(x_ref[...], sel_ref[...],
                      preferred_element_type=jnp.float32)                 # (TB, B*B)
    o_ref[...] = y_ref[...] - 1000.0 * illegal


def noswitch_wrapper_forward(x, internal_logits, *, batch_tile=256):
    """Fused NoSwitchWrapperModel forward.

    x:               (N, C, H, W) NCHW board encoding, H == W == board_size + 2
    internal_logits: (N, board_size**2) output of the wrapped internal model
    returns:         (N, board_size**2)
    """
    N, C, H, W = x.shape
    assert H == W and H > 2, "expected a square padded board (H == W == board_size + 2)"
    B = H - 2
    P = B * B
    K = C * H * W
    assert internal_logits.shape == (N, P)

    # Native-layout flatten (contiguous, no transpose): spatial extent -> lanes.
    x_flat = x.reshape(N, K).astype(jnp.float32)
    y = internal_logits.astype(jnp.float32)
    sel = _interior_selection_matrix(C, H, W)                             # (K, P)

    # Batch tiling with a padded tail instead of a divisibility assert.
    TB = min(batch_tile, _round_up(N, 8))       # >= 8 rows, capped for multi-tile grids
    Np = _round_up(N, TB)
    if Np != N:
        x_flat = jnp.pad(x_flat, ((0, Np - N), (0, 0)))
        y = jnp.pad(y, ((0, Np - N), (0, 0)))

    grid = (Np // TB,)
    out = pl.pallas_call(
        _noswitch_kernel,
        out_shape=jax.ShapeDtypeStruct((Np, P), jnp.float32),
        grid_spec=pltpu.PrefetchScalarGridSpec(
            num_scalar_prefetch=0,
            grid=grid,
            in_specs=[
                pl.BlockSpec((TB, K), lambda i: (i, 0)),   # board rows
                pl.BlockSpec((TB, P), lambda i: (i, 0)),   # internal-model logits
                pl.BlockSpec((K, P), lambda i: (0, 0)),    # selection matrix (resident)
            ],
            out_specs=pl.BlockSpec((TB, P), lambda i: (i, 0)),
        ),
        compiler_params=pltpu.CompilerParams(
            dimension_semantics=("parallel",)),
    )(x_flat, y, sel)

    return out[:N]


def noswitch_wrapper_ref(x, internal_logits, board_size):
    """Pure-JAX reference matching the PyTorch forward exactly."""
    illegal = 1000.0 * jnp.sum(x[:, :, 1:-1, 1:-1], axis=1).reshape(-1, board_size ** 2)
    return internal_logits - illegal


if __name__ == "__main__":
    key = jax.random.PRNGKey(0)
    k_board, k_logits = jax.random.split(key)

    # Small shapes consistent with the module: batch=2, 2 board planes,
    # 16x16 padded board => board_size = 14, output (2, 196).
    N, C, H, W = 2, 2, 16, 16
    board_size = H - 2

    # Hex board planes are {0, 1} stone indicators.
    x = (jax.random.uniform(k_board, (N, C, H, W)) < 0.5).astype(jnp.float32)
    internal_logits = jax.random.normal(k_logits, (N, board_size ** 2), jnp.float32)

    out = noswitch_wrapper_forward(x, internal_logits)
    out = jax.block_until_ready(out)

    ref = noswitch_wrapper_ref(x, internal_logits, board_size)
    assert out.shape == (N, board_size ** 2)
    max_err = jnp.max(jnp.abs(out - ref))
    assert jnp.allclose(out, ref, atol=1e-3, rtol=1e-5), f"max err {max_err}"

    print("KERNEL_OK")
</pallas_src>

<mosaic_0001>
module attributes {stable_mosaic.version = 11 : i64} {
  func.func @_noswitch_kernel(%arg0: i32, %arg1: memref<8x512xf32, #tpu.memory_space<vmem>>, %arg2: memref<8x196xf32, #tpu.memory_space<vmem>>, %arg3: memref<512x196xf32, #tpu.memory_space<vmem>>, %arg4: memref<8x196xf32, #tpu.memory_space<vmem>>) attributes {dimension_semantics = [#tpu.dimension_semantics<parallel>], iteration_bounds = array<i64: 1>, scalar_prefetch = 0 : i64, scratch_operands = 0 : i64, tpu.core_type = #tpu.core_type<tc>, window_params = [{transform_indices = @transform_0, window_bounds = array<i64: 8, 512>}, {transform_indices = @transform_1, window_bounds = array<i64: 8, 196>}, {pipeline_mode = #tpu.pipeline_mode<synchronous>, transform_indices = @transform_2, window_bounds = array<i64: 512, 196>}, {transform_indices = @transform_3, window_bounds = array<i64: 8, 196>}]} {
    %c0 = arith.constant 0 : index
    %c0_0 = arith.constant 0 : index
    %0 = vector.load %arg1[%c0, %c0_0] : memref<8x512xf32, #tpu.memory_space<vmem>>, vector<8x512xf32>
    %c0_1 = arith.constant 0 : index
    %c0_2 = arith.constant 0 : index
    %1 = vector.load %arg3[%c0_1, %c0_2] : memref<512x196xf32, #tpu.memory_space<vmem>>, vector<512x196xf32>
    %cst = arith.constant dense<0.000000e+00> : vector<8x196xf32>
    %2 = tpu.matmul %0, %1, %cst {dimension_numbers = #tpu.dot_dimension_numbers<[1], [0], [0], [1], [0, 0, 1, 1], [], []>} : vector<8x512xf32>, vector<512x196xf32>, vector<8x196xf32> -> vector<8x196xf32>
    %c0_3 = arith.constant 0 : index
    %c0_4 = arith.constant 0 : index
    %3 = vector.load %arg2[%c0_3, %c0_4] : memref<8x196xf32, #tpu.memory_space<vmem>>, vector<8x196xf32>
    %cst_5 = arith.constant 1.000000e+03 : f32
    %4 = vector.broadcast %cst_5 : f32 to vector<8x196xf32>
    %5 = arith.mulf %4, %2 : vector<8x196xf32>
    %6 = arith.subf %3, %5 : vector<8x196xf32>
    %c0_6 = arith.constant 0 : index
    %c0_7 = arith.constant 0 : index
    %7 = vector.load %arg4[%c0_6, %c0_7] : memref<8x196xf32, #tpu.memory_space<vmem>>, vector<8x196xf32>
    tpu.vector_store %arg4[%c0_6, %c0_7], %6 {strides = array<i32>} : memref<8x196xf32, #tpu.memory_space<vmem>>, vector<8x196xf32>,
    return
  }
  func.func @transform_0(%arg0: i32) -> (i32, i32) {
    %c0_i32 = arith.constant 0 : i32
    %c0_i32_0 = arith.constant 0 : i32
    return %arg0, %c0_i32 : i32, i32
  }
  func.func @transform_1(%arg0: i32) -> (i32, i32) {
    %c0_i32 = arith.constant 0 : i32
    %c0_i32_0 = arith.constant 0 : i32
    return %arg0, %c0_i32 : i32, i32
  }
  func.func @transform_2(%arg0: i32) -> (i32, i32) {
    %c0_i32 = arith.constant 0 : i32
    %c0_i32_0 = arith.constant 0 : i32
    %c0_i32_1 = arith.constant 0 : i32
    return %c0_i32, %c0_i32_0 : i32, i32
  }
  func.func @transform_3(%arg0: i32) -> (i32, i32) {
    %c0_i32 = arith.constant 0 : i32
    %c0_i32_0 = arith.constant 0 : i32
    return %arg0, %c0_i32 : i32, i32
  }
}

</mosaic_0001>

<bundles_post_ra>
// kernel: tpu_custom_call.1
= control target key start
LH: loop header
LB: loop body
LE: loop exit
PB: predicated region body
PF: predicated region fallthrough
CT: control target
= control target key end

     0   :  { %s761_s0 = inlined_call_operand.vmem [shape: f32[8,512], index: 0, kind: input, shape index: {}]   ;;  %s762_s1 = inlined_call_operand.vmem [shape: f32[8,196], index: 1, kind: input, shape index: {}]   ;;  %s763_s2 = inlined_call_operand.vmem [shape: f32[512,196], index: 2, kind: input, shape index: {}]   ;;  %s764_s3 = inlined_call_operand.hbm [shape: f32[8,196], index: 3, kind: output, shape index: {}]  }
   0x1   :  { %v50_v0 = vld [vmem:[%s763_s2 + $0xf8] sm:$0xff]  ;;  %v49_v2 = vld [vmem:[%s763_s2 + $0xf0] sm:$0xff]  ;;  %v48_v4 = vld [vmem:[%s763_s2 + $0xe8] sm:$0xff] }
   0x2   :  { %v114_v1 = vld [vmem:[%s763_s2 + $0x2f8] sm:$0xff]  ;;  %147 = vmatprep.subr.mxu0 %v50_v0  ;;  %v113_v3 = vld [vmem:[%s763_s2 + $0x2f0] sm:$0xff]  ;;  %v112_v5 = vld [vmem:[%s763_s2 + $0x2e8] sm:$0xff] }
   0x3   :  { %218 = vmatprep.subr.mxu1 %v114_v1  ;;  %148 = vmatpush1.msra.mxu0 %v49_v2  ;;  %v47_v6 = vld [vmem:[%s763_s2 + $0xe0] sm:$0xff]  ;;  %v46_v8 = vld [vmem:[%s763_s2 + $0xd8] sm:$0xff]  ;;  %v45_v10 = vld [vmem:[%s763_s2 + $0xd0] sm:$0xff] }
   0x4   :  { %219 = vmatpush1.msra.mxu1 %v113_v3  ;;  %v111_v7 = vld [vmem:[%s763_s2 + $0x2e0] sm:$0xff]  ;;  %149 = vmatprep.subr.mxu0 %v48_v4  ;;  %v110_v9 = vld [vmem:[%s763_s2 + $0x2d8] sm:$0xff]  ;;  %v109_v11 = vld [vmem:[%s763_s2 + $0x2d0] sm:$0xff] }
   0x5   :  { %220 = vmatprep.subr.mxu1 %v112_v5  ;;  %150 = vmatpush1.msra.mxu0 %v47_v6  ;;  %v44_v12 = vld [vmem:[%s763_s2 + $0xc8] sm:$0xff]  ;;  %v43_v14 = vld [vmem:[%s763_s2 + $0xc0] sm:$0xff]  ;;  %v42_v16 = vld [vmem:[%s763_s2 + $0xb8] sm:$0xff] }
   0x6   :  { %221 = vmatpush1.msra.mxu1 %v111_v7  ;;  %v108_v13 = vld [vmem:[%s763_s2 + $0x2c8] sm:$0xff]  ;;  %151 = vmatprep.subr.mxu0 %v46_v8  ;;  %v107_v15 = vld [vmem:[%s763_s2 + $0x2c0] sm:$0xff]  ;;  %v106_v17 = vld [vmem:[%s763_s2 + $0x2b8] sm:$0xff] }
   0x7   :  { %222 = vmatprep.subr.mxu1 %v110_v9  ;;  %152 = vmatpush1.msra.mxu0 %v45_v10  ;;  %v41_v18 = vld [vmem:[%s763_s2 + $0xb0] sm:$0xff]  ;;  %v40_v20 = vld [vmem:[%s763_s2 + $0xa8] sm:$0xff]  ;;  %v39_v22 = vld [vmem:[%s763_s2 + $0xa0] sm:$0xff] }
   0x8   :  { %223 = vmatpush1.msra.mxu1 %v109_v11  ;;  %153 = vmatprep.subr.mxu0 %v44_v12  ;;  %v105_v19 = vld [vmem:[%s763_s2 + $0x2b0] sm:$0xff]  ;;  %v104_v21 = vld [vmem:[%s763_s2 + $0x2a8] sm:$0xff]  ;;  %v103_v23 = vld [vmem:[%s763_s2 + $0x2a0] sm:$0xff] }
   0x9   :  { %224 = vmatprep.subr.mxu1 %v108_v13  ;;  %154 = vmatpush1.msra.mxu0 %v43_v14  ;;  %v38_v24 = vld [vmem:[%s763_s2 + $0x98] sm:$0xff]  ;;  %v37_v26 = vld [vmem:[%s763_s2 + $0x90] sm:$0xff]  ;;  %v36_v28 = vld [vmem:[%s763_s2 + $0x88] sm:$0xff] }
   0xa   :  { %225 = vmatpush1.msra.mxu1 %v107_v15  ;;  %155 = vmatprep.subr.mxu0 %v42_v16  ;;  %v102_v25 = vld [vmem:[%s763_s2 + $0x298] sm:$0xff]  ;;  %v101_v27 = vld [vmem:[%s763_s2 + $0x290] sm:$0xff]  ;;  %v100_v29 = vld [vmem:[%s763_s2 + $0x288] sm:$0xff] }
   0xb   :  { %226 = vmatprep.subr.mxu1 %v106_v17  ;;  %156 = vmatpush1.msra.mxu0 %v41_v18  ;;  %v35_v30 = vld [vmem:[%s763_s2 + $0x80] sm:$0xff]  ;;  %v34_v32 = vld [vmem:[%s763_s2 + $0x78] sm:$0xff]  ;;  %v33_v34 = vld [vmem:[%s763_s2 + $0x70] sm:$0xff] }
   0xc   :  { %227 = vmatpush1.msra.mxu1 %v105_v19  ;;  %157 = vmatprep.subr.mxu0 %v40_v20  ;;  %v99_v31 = vld [vmem:[%s763_s2 + $0x280] sm:$0xff]  ;;  %v98_v33 = vld [vmem:[%s763_s2 + $0x278] sm:$0xff]  ;;  %v97_v35 = vld [vmem:[%s763_s2 + $0x270] sm:$0xff] }
   0xd   :  { %228 = vmatprep.subr.mxu1 %v104_v21  ;;  %158 = vmatpush1.msra.mxu0 %v39_v22  ;;  %v32_v36 = vld [vmem:[%s763_s2 + $0x68] sm:$0xff]  ;;  %v31_v38 = vld [vmem:[%s763_s2 + $0x60] sm:$0xff]  ;;  %v30_v40 = vld [vmem:[%s763_s2 + $0x58] sm:$0xff] }
   0xe   :  { %229 = vmatpush1.msra.mxu1 %v103_v23  ;;  %159 = vmatprep.subr.mxu0 %v38_v24  ;;  %v96_v37 = vld [vmem:[%s763_s2 + $0x268] sm:$0xff]  ;;  %v95_v39 = vld [vmem:[%s763_s2 + $0x260] sm:$0xff]  ;;  %v94_v41 = vld [vmem:[%s763_s2 + $0x258] sm:$0xff] }
   0xf   :  { %230 = vmatprep.subr.mxu1 %v102_v25  ;;  %160 = vmatpush1.msra.mxu0 %v37_v26  ;;  %v29_v42 = vld [vmem:[%s763_s2 + $0x50] sm:$0xff]  ;;  %v28_v44 = vld [vmem:[%s763_s2 + $0x48] sm:$0xff]  ;;  %v27_v46 = vld [vmem:[%s763_s2 + $0x40] sm:$0xff] }
  0x10   :  { %231 = vmatpush1.msra.mxu1 %v101_v27  ;;  %161 = vmatprep.subr.mxu0 %v36_v28  ;;  %v93_v43 = vld [vmem:[%s763_s2 + $0x250] sm:$0xff]  ;;  %v92_v45 = vld [vmem:[%s763_s2 + $0x248] sm:$0xff]  ;;  %v91_v47 = vld [vmem:[%s763_s2 + $0x240] sm:$0xff] }
  0x11   :  { %232 = vmatprep.subr.mxu1 %v100_v29  ;;  %162 = vmatpush1.msra.mxu0 %v35_v30  ;;  %v26_v48 = vld [vmem:[%s763_s2 + $0x38] sm:$0xff]  ;;  %v25_v50 = vld [vmem:[%s763_s2 + $0x30] sm:$0xff]  ;;  %v24_v52 = vld [vmem:[%s763_s2 + $0x28] sm:$0xff] }
  0x12   :  { %233 = vmatpush1.msra.mxu1 %v99_v31  ;;  %163 = vmatprep.subr.mxu0 %v34_v32  ;;  %v90_v49 = vld [vmem:[%s763_s2 + $0x238] sm:$0xff]  ;;  %v89_v51 = vld [vmem:[%s763_s2 + $0x230] sm:$0xff]  ;;  %v88_v53 = vld [vmem:[%s763_s2 + $0x228] sm:$0xff] }
  0x13   :  { %234 = vmatprep.subr.mxu1 %v98_v33  ;;  %164 = vmatpush1.msra.mxu0 %v33_v34  ;;  %v23_v54 = vld [vmem:[%s763_s2 + $0x20] sm:$0xff]  ;;  %v22_v56 = vld [vmem:[%s763_s2 + $0x18] sm:$0xff]  ;;  %v21_v58 = vld [vmem:[%s763_s2 + $0x10] sm:$0xff] }
  0x14   :  { %235 = vmatpush1.msra.mxu1 %v97_v35  ;;  %165 = vmatprep.subr.mxu0 %v32_v36  ;;  %v87_v55 = vld [vmem:[%s763_s2 + $0x220] sm:$0xff]  ;;  %v86_v57 = vld [vmem:[%s763_s2 + $0x218] sm:$0xff]  ;;  %v85_v59 = vld [vmem:[%s763_s2 + $0x210] sm:$0xff] }
  0x15   :  { %236 = vmatprep.subr.mxu1 %v96_v37  ;;  %166 = vmatpush1.msra.mxu0 %v31_v38  ;;  %v20_v60 = vld [vmem:[%s763_s2 + $0x8] sm:$0xff]  ;;  %v19_v62 = vld [vmem:[%s763_s2] sm:$0xff]  ;;  %v82_v0 = vld [vmem:[%s763_s2 + $0x1f8] sm:$0xff] }
  0x16   :  { %237 = vmatpush1.msra.mxu1 %v95_v39  ;;  %167 = vmatprep.subr.mxu0 %v30_v40  ;;  %v84_v61 = vld [vmem:[%s763_s2 + $0x208] sm:$0xff]  ;;  %v83_v63 = vld [vmem:[%s763_s2 + $0x200] sm:$0xff]  ;;  %v146_v1 = vld [vmem:[%s763_s2 + $0x3f8] sm:$0xff] }
  0x17   :  { %238 = vmatprep.subr.mxu1 %v94_v41  ;;  %168 = vmatpush1.msra.mxu0 %v29_v42  ;;  %v81_v2 = vld [vmem:[%s763_s2 + $0x1f0] sm:$0xff]  ;;  %v80_v4 = vld [vmem:[%s763_s2 + $0x1e8] sm:$0xff]  ;;  %v79_v6 = vld [vmem:[%s763_s2 + $0x1e0] sm:$0xff] }
  0x18   :  { %239 = vmatpush1.msra.mxu1 %v93_v43  ;;  %169 = vmatprep.subr.mxu0 %v28_v44  ;;  %v145_v3 = vld [vmem:[%s763_s2 + $0x3f0] sm:$0xff]  ;;  %v144_v5 = vld [vmem:[%s763_s2 + $0x3e8] sm:$0xff]  ;;  %v143_v7 = vld [vmem:[%s763_s2 + $0x3e0] sm:$0xff] }
  0x19   :  { %240 = vmatprep.subr.mxu1 %v92_v45  ;;  %170 = vmatpush1.msra.mxu0 %v27_v46  ;;  %v78_v8 = vld [vmem:[%s763_s2 + $0x1d8] sm:$0xff]  ;;  %v77_v10 = vld [vmem:[%s763_s2 + $0x1d0] sm:$0xff]  ;;  %v76_v12 = vld [vmem:[%s763_s2 + $0x1c8] sm:$0xff] }
  0x1a   :  { %241 = vmatpush1.msra.mxu1 %v91_v47  ;;  %171 = vmatprep.subr.mxu0 %v26_v48  ;;  %v142_v9 = vld [vmem:[%s763_s2 + $0x3d8] sm:$0xff]  ;;  %v141_v11 = vld [vmem:[%s763_s2 + $0x3d0] sm:$0xff]  ;;  %v140_v13 = vld [vmem:[%s763_s2 + $0x3c8] sm:$0xff] }
  0x1b   :  { %242 = vmatprep.subr.mxu1 %v90_v49  ;;  %172 = vmatpush1.msra.mxu0 %v25_v50  ;;  %v75_v14 = vld [vmem:[%s763_s2 + $0x1c0] sm:$0xff]  ;;  %v74_v16 = vld [vmem:[%s763_s2 + $0x1b8] sm:$0xff]  ;;  %v73_v18 = vld [vmem:[%s763_s2 + $0x1b0] sm:$0xff] }
  0x1c   :  { %243 = vmatpush1.msra.mxu1 %v89_v51  ;;  %173 = vmatprep.subr.mxu0 %v24_v52  ;;  %v139_v15 = vld [vmem:[%s763_s2 + $0x3c0] sm:$0xff]  ;;  %v138_v17 = vld [vmem:[%s763_s2 + $0x3b8] sm:$0xff]  ;;  %v137_v19 = vld [vmem:[%s763_s2 + $0x3b0] sm:$0xff] }
  0x1d   :  { %244 = vmatprep.subr.mxu1 %v88_v53  ;;  %174 = vmatpush1.msra.mxu0 %v23_v54  ;;  %v72_v20 = vld [vmem:[%s763_s2 + $0x1a8] sm:$0xff]  ;;  %v71_v22 = vld [vmem:[%s763_s2 + $0x1a0] sm:$0xff]  ;;  %v70_v24 = vld [vmem:[%s763_s2 + $0x198] sm:$0xff] }
  0x1e   :  { %245 = vmatpush1.msra.mxu1 %v87_v55  ;;  %175 = vmatprep.subr.mxu0 %v22_v56  ;;  %v136_v21 = vld [vmem:[%s763_s2 + $0x3a8] sm:$0xff]  ;;  %v135_v23 = vld [vmem:[%s763_s2 + $0x3a0] sm:$0xff]  ;;  %v134_v25 = vld [vmem:[%s763_s2 + $0x398] sm:$0xff] }
  0x1f   :  { %246 = vmatprep.subr.mxu1 %v86_v57  ;;  %176 = vmatpush1.msra.mxu0 %v21_v58  ;;  %v69_v26 = vld [vmem:[%s763_s2 + $0x190] sm:$0xff]  ;;  %v68_v28 = vld [vmem:[%s763_s2 + $0x188] sm:$0xff] }
  0x20   :  { %247 = vmatpush1.msra.mxu1 %v85_v59  ;;  %177 = vmatprep.subr.mxu0 %v20_v60  ;;  %v133_v27 = vld [vmem:[%s763_s2 + $0x390] sm:$0xff]  ;;  %v132_v29 = vld [vmem:[%s763_s2 + $0x388] sm:$0xff] }
  0x21   :  { %248 = vmatprep.subr.mxu1 %v84_v61  ;;  %178 = vmatpush1.msra.mxu0 %v19_v62 }
  0x22   :  { %249 = vmatpush1.msra.mxu1 %v83_v63  ;;  %179 = vmatprep.subr.mxu0 %v82_v0 }
  0x23   :  { %250 = vmatprep.subr.mxu1 %v146_v1  ;;  %180 = vmatpush2.msra.mxu0 %v81_v2 }
  0x24   :  { %251 = vmatpush2.msra.mxu1 %v145_v3  ;;  %181 = vmatprep.subr.mxu0 %v80_v4 }
  0x25   :  { %252 = vmatprep.subr.mxu1 %v144_v5  ;;  %182 = vmatpush2.msra.mxu0 %v79_v6 }
  0x26   :  { %253 = vmatpush2.msra.mxu1 %v143_v7  ;;  %183 = vmatprep.subr.mxu0 %v78_v8 }
  0x27   :  { %254 = vmatprep.subr.mxu1 %v142_v9  ;;  %184 = vmatpush2.msra.mxu0 %v77_v10 }
  0x28   :  { %255 = vmatpush2.msra.mxu1 %v141_v11  ;;  %185 = vmatprep.subr.mxu0 %v76_v12 }
  0x29   :  { %256 = vmatprep.subr.mxu1 %v140_v13  ;;  %186 = vmatpush2.msra.mxu0 %v75_v14 }
  0x2a   :  { %257 = vmatpush2.msra.mxu1 %v139_v15  ;;  %187 = vmatprep.subr.mxu0 %v74_v16 }
  0x2b   :  { %258 = vmatprep.subr.mxu1 %v138_v17  ;;  %188 = vmatpush2.msra.mxu0 %v73_v18 }
  0x2c   :  { %259 = vmatpush2.msra.mxu1 %v137_v19  ;;  %189 = vmatprep.subr.mxu0 %v72_v20 }
  0x2d   :  { %260 = vmatprep.subr.mxu1 %v136_v21  ;;  %190 = vmatpush2.msra.mxu0 %v71_v22 }
  0x2e   :  { %261 = vmatpush2.msra.mxu1 %v135_v23 }
  0x2f   :  { %8 = vsyncpa [#allocation3], 0  ;;  %191 = vmatprep.subr.mxu0 %v70_v24  ;;  %262 = vmatprep.subr.mxu1 %v134_v25  ;;  %v67_v30 = vld [vmem:[%s763_s2 + $0x180] sm:$0xff]  ;;  %v66_v32 = vld [vmem:[%s763_s2 + $0x178] sm:$0xff]  ;;  %vm296_vm0 = vcmask 556032  }
  0x30   :  { %v131_v31 = vld [vmem:[%s763_s2 + $0x380] sm:$0xff]  ;;  %192 = vmatpush2.msra.mxu0 %v69_v26  ;;  %263 = vmatpush2.msra.mxu1 %v133_v27  ;;  %v130_v33 = vld [vmem:[%s763_s2 + $0x378] sm:$0xff]  ;;  %v65_v34 = vld [vmem:[%s763_s2 + $0x170] sm:$0xff] }
  0x31   :  { %193 = vmatprep.subr.mxu0 %v68_v28  ;;  %264 = vmatprep.subr.mxu1 %v132_v29  ;;  %v129_v35 = vld [vmem:[%s763_s2 + $0x370] sm:$0xff]  ;;  %v64_v36 = vld [vmem:[%s763_s2 + $0x168] sm:$0xff]  ;;  %v63_v38 = vld [vmem:[%s763_s2 + $0x160] sm:$0xff] }
  0x32   :  { %194 = vmatpush2.msra.mxu0 %v67_v30  ;;  %265 = vmatpush2.msra.mxu1 %v131_v31  ;;  %v128_v37 = vld [vmem:[%s763_s2 + $0x368] sm:$0xff]  ;;  %v127_v39 = vld [vmem:[%s763_s2 + $0x360] sm:$0xff]  ;;  %v62_v40 = vld [vmem:[%s763_s2 + $0x158] sm:$0xff] }
  0x33   :  { %195 = vmatprep.subr.mxu0 %v66_v32  ;;  %266 = vmatprep.subr.mxu1 %v130_v33  ;;  %v126_v41 = vld [vmem:[%s763_s2 + $0x358] sm:$0xff]  ;;  %v61_v42 = vld [vmem:[%s763_s2 + $0x150] sm:$0xff]  ;;  %v60_v44 = vld [vmem:[%s763_s2 + $0x148] sm:$0xff] }
  0x34   :  { %196 = vmatpush2.msra.mxu0 %v65_v34  ;;  %267 = vmatpush2.msra.mxu1 %v129_v35  ;;  %v125_v43 = vld [vmem:[%s763_s2 + $0x350] sm:$0xff]  ;;  %v124_v45 = vld [vmem:[%s763_s2 + $0x348] sm:$0xff]  ;;  %v59_v46 = vld [vmem:[%s763_s2 + $0x140] sm:$0xff] }
  0x35   :  { %197 = vmatprep.subr.mxu0 %v64_v36  ;;  %268 = vmatprep.subr.mxu1 %v128_v37  ;;  %v123_v47 = vld [vmem:[%s763_s2 + $0x340] sm:$0xff]  ;;  %v58_v48 = vld [vmem:[%s763_s2 + $0x138] sm:$0xff]  ;;  %v57_v50 = vld [vmem:[%s763_s2 + $0x130] sm:$0xff] }
  0x36   :  { %198 = vmatpush2.msra.mxu0 %v63_v38  ;;  %269 = vmatpush2.msra.mxu1 %v127_v39  ;;  %v122_v49 = vld [vmem:[%s763_s2 + $0x338] sm:$0xff]  ;;  %v121_v51 = vld [vmem:[%s763_s2 + $0x330] sm:$0xff]  ;;  %v56_v52 = vld [vmem:[%s763_s2 + $0x128] sm:$0xff] }
  0x37   :  { %199 = vmatprep.subr.mxu0 %v62_v40  ;;  %270 = vmatprep.subr.mxu1 %v126_v41  ;;  %v120_v53 = vld [vmem:[%s763_s2 + $0x328] sm:$0xff]  ;;  %v55_v54 = vld [vmem:[%s763_s2 + $0x120] sm:$0xff]  ;;  %v54_v56 = vld [vmem:[%s763_s2 + $0x118] sm:$0xff] }
  0x38   :  { %200 = vmatpush2.msra.mxu0 %v61_v42  ;;  %271 = vmatpush2.msra.mxu1 %v125_v43  ;;  %v119_v55 = vld [vmem:[%s763_s2 + $0x320] sm:$0xff]  ;;  %v118_v57 = vld [vmem:[%s763_s2 + $0x318] sm:$0xff]  ;;  %v53_v58 = vld [vmem:[%s763_s2 + $0x110] sm:$0xff] }
  0x39   :  { %201 = vmatprep.subr.mxu0 %v60_v44  ;;  %272 = vmatprep.subr.mxu1 %v124_v45  ;;  %v117_v59 = vld [vmem:[%s763_s2 + $0x310] sm:$0xff]  ;;  %v52_v60 = vld [vmem:[%s763_s2 + $0x108] sm:$0xff]  ;;  %v51_v62 = vld [vmem:[%s763_s2 + $0x100] sm:$0xff] }
  0x3a   :  { %202 = vmatpush2.msra.mxu0 %v59_v46  ;;  %273 = vmatpush2.msra.mxu1 %v123_v47  ;;  %v116_v61 = vld [vmem:[%s763_s2 + $0x308] sm:$0xff]  ;;  %v115_v0 = vld [vmem:[%s763_s2 + $0x300] sm:$0xff]  ;;  %v18_v1 = vld [vmem:[%s761_s0 + $0x18] sm:$0xff] }
  0x3b   :  { %203 = vmatprep.subr.mxu0 %v58_v48  ;;  %274 = vmatprep.subr.mxu1 %v122_v49  ;;  %v16_v63 = vld [vmem:[%s761_s0 + $0x8] sm:$0xff]  ;;  %v15_v2 = vld [vmem:[%s761_s0] sm:$0xff]  ;;  %v17_v3 = vld [vmem:[%s761_s0 + $0x10] sm:$0xff]  ;;  %s335_s0 = smov [#allocation2]  }
  0x3c   :  { %204 = vmatpush2.msra.mxu0 %v57_v50  ;;  %275 = vmatpush2.msra.mxu1 %v121_v51  ;;  %v289_v7 = vld [vmem:[%s762_s1] sm:$0xff]  ;;  %v290_v12 = vld [vmem:[%s762_s1 + $0x8] sm:$0xff]  ;;  %s304_s9 = sshll.u32 %s335_s0, 4  ;;  %s305_s9 = int_to_ptr.vmem [resolvable:$true] %s304_s9 }
  0x3d   :  { %205 = vmatprep.subr.mxu0 %v56_v52  ;;  %276 = vmatprep.subr.mxu1 %v120_v53  ;;  %s313_s10 = scalar_lea.vmem %s305_s9, 256  ;;  %p318_p1 = scmp.lt.s32.totalorder %s305_s9, %s305_s9 }
  0x3e   :  { %206 = vmatpush2.msra.mxu0 %v55_v54  ;;  %277 = vmatpush2.msra.mxu1 %v119_v55  ;;  %p314_p0 = scmp.ne.s32.totalorder %s305_s9, %s313_s10  ;;  %p319_p2 = scmp.lt.s32.totalorder %s313_s10, %s313_s10 }
  0x3f   :  { %207 = vmatprep.subr.mxu0 %v54_v56  ;;  %278 = vmatprep.subr.mxu1 %v118_v57 }
  0x40   :  { %208 = vmatpush2.msra.mxu0 %v53_v58  ;;  %279 = vmatpush2.msra.mxu1 %v117_v59  ;;  %p320_p3 = por %p319_p2, %p318_p1 }
  0x41   :  { %209 = vmatprep.subr.mxu0 %v52_v60  ;;  %280 = vmatprep.subr.mxu1 %v116_v61 }
  0x42   :  { %210 = vmatpush2.msra.mxu0 %v51_v62  ;;  %211 = vmatprep.mubr.f32.mxu0 %v16_v63  ;;  %p321_p4 = pnand %p320_p3, %p314_p0 }
  0x43   :  { %281 = vmatpush2.msra.mxu1 %v115_v0  ;;  %282 = vmatprep.mubr.f32.mxu1 %v18_v1 }
  0x44   :  { %212 = vmatmul.mubr.f32.vlgmr.msra.gmra.mxu0 %v15_v2  ;;  %283 = vmatmul.mubr.f32.vlgmr.msra.gmra.mxu1 %v17_v3 }
 0x104   :  { %v213_v4 = vpop.f32.mrf.mxu0  ;;  %v284_v5 = vpop.f32.mrf.mxu1 }
 0x105   :  { %v285_v6 = vadd.f32 %v284_v5, %v213_v4 }
 0x106   :  { %v215_v8 = vpop.f32.mrf.mxu0  ;;  %v286_v9 = vpop.f32.mrf.mxu1 }
 0x107   :  { %v291_v10 = vmul.f32 1000.0, %v285_v6  ;;  %v287_v11 = vadd.f32 %v286_v9, %v215_v8 }
 0x109   :  { %v293_v13 = vsub.f32 %v289_v7, %v291_v10  ;;  %v292_v14 = vmul.f32 1000.0, %v287_v11 }
 0x10b   :  { %295 = vst [vmem:[#allocation2] sm:$0xff] %v293_v13  ;;  %v294_v15 = vsub.f32 %v290_v12, %v292_v14 }
 0x10d   :  { %297 = vst.msk [vmem:[#allocation2 + $0x8] sm:$0xff] %vm296_vm0, %v294_v15 }
 0x10e   :  { %324 = shalt.err (!%p321_p4)
}
 0x10f   :  { %307 = dma.vmem_to_hbm [thread:$0]  %s305_s9, 256, %s764_s3, [#allocation3]  }
 0x110   :  { %333 = dma.done.wait [#allocation3], 256  }
 0x111   :  { %334 = vsyncadd [#allocation3], 4294967040 }
 0x112   :  { %311 = vsyncpa [#allocation3], 1 }

</bundles_post_ra>
